<compile_context>
chip_gen: v5e
topology: v5e:2x2
jax: 0.10.0
libtpu: 0.0.40
codegen_flags: <defaults>
</compile_context>

<pallas_src>
import math

import jax
import jax.numpy as jnp
from jax.experimental import pallas as pl
from jax.experimental.pallas import tpu as pltpu

LANE = 128
_MIB = 1024 * 1024


def _sublanes_for(dtype) -> int:
    """Minimum sublane multiple for a packed TPU tile of this dtype."""
    itemsize = jnp.dtype(dtype).itemsize
    return max(8, 32 // itemsize)  # f32 -> 8, bf16 -> 16, int8/fp8 -> 32


def _generation_budgets():
    """(target_block_bytes, vmem_limit_bytes) sized for this chip generation."""
    try:
        vmem_cap = int(pltpu.get_tpu_info().vmem_capacity_bytes)
    except Exception:  # unknown backend / interpret mode -> assume 128 MiB VMEM
        vmem_cap = 128 * _MIB
    if vmem_cap <= 64 * _MIB:        # v7x-class: 64 MiB VMEM per TensorCore
        return 6 * _MIB, 40 * _MIB   # 4 bufs * 6 MiB = 24 MiB + headroom
    return 8 * _MIB, 48 * _MIB       # v5e/v6e: 128 MiB VMEM (scoped default 16/32)


def _swish_beta_kernel(beta_ref, x_ref, o_ref):
    # beta_ref: (1,1) f32 in SMEM.  x_ref / o_ref: (block_rows, W) in VMEM.
    # Single-transcendental swish: x*sigmoid(b*x) == 0.5*x*(1 + tanh(0.5*b*x)).
    half_beta = 0.5 * beta_ref[0, 0]
    xf = x_ref[...].astype(jnp.float32)
    y = 0.5 * xf * (1.0 + jnp.tanh(half_beta * xf))
    o_ref[...] = y.astype(o_ref.dtype)


def _swish_beta_2d(x2d, beta_arr, *, target_block_bytes, vmem_limit_bytes):
    """Run the kernel on a lane-dense (rows, W) slab; W is a multiple of 128."""
    rows, W = x2d.shape
    dtype = x2d.dtype
    itemsize = jnp.dtype(dtype).itemsize
    sub = _sublanes_for(dtype)
    total_bytes = rows * W * itemsize

    # Bytes-targeted block height.
    rows_per_block = max(sub, (target_block_bytes // (W * itemsize)) // sub * sub)

    # Keep enough grid steps for DMA double-buffer overlap and for sharding the
    # 1-D "parallel" grid across v7x's two TensorCores.
    if total_bytes > 1 * _MIB:
        min_steps = 8
    elif rows >= 2 * sub:
        min_steps = 2
    else:
        min_steps = 1
    max_block_rows = max(sub, (rows // min_steps) // sub * sub)

    block_rows = min(rows_per_block, max_block_rows, rows)
    if block_rows != rows:  # partial blocks allowed; keep sublane alignment
        block_rows = max(sub, (block_rows // sub) * sub)
    grid = (pl.cdiv(rows, block_rows),)

    return pl.pallas_call(
        _swish_beta_kernel,
        out_shape=jax.ShapeDtypeStruct((rows, W), dtype),
        grid=grid,
        in_specs=[
            pl.BlockSpec(memory_space=pltpu.MemorySpace.SMEM),       # beta (1,1)
            pl.BlockSpec((block_rows, W), lambda i: (i, 0)),
        ],
        out_specs=pl.BlockSpec((block_rows, W), lambda i: (i, 0)),
        compiler_params=pltpu.CompilerParams(
            dimension_semantics=("parallel",),
            vmem_limit_bytes=vmem_limit_bytes,
        ),
        # TODO(synk): expose input_output_aliases={1: 0} when the caller can
        # donate x (halves peak HBM footprint; HBM traffic unchanged).
    )(beta_arr, x2d)


def swish_beta(x, beta):
    """Forward of SwishBeta: x * sigmoid(beta * x). x: any shape; beta: scalar."""
    orig_shape = x.shape
    dtype = x.dtype
    n = int(math.prod(orig_shape)) if orig_shape else 1

    beta_arr = jnp.asarray(beta, dtype=jnp.float32).reshape(1, 1)
    target_block_bytes, vmem_limit_bytes = _generation_budgets()

    # Prefer a wide lane width W (multiple of 128) that divides n exactly, so
    # the whole tensor is one lane-dense slab with no padding / tail handling.
    W = next((c for c in (1024, 512, 256, 128) if n % c == 0), None)
    if W is not None:
        out2d = _swish_beta_2d(
            x.reshape(-1, W), beta_arr,
            target_block_bytes=target_block_bytes,
            vmem_limit_bytes=vmem_limit_bytes)
        return out2d.reshape(orig_shape)

    # Ragged size: kernel on the largest lane-aligned prefix, tiny tail in jnp.
    x_flat = x.reshape(-1)
    W = 1024 if n >= 1024 else LANE
    n_main = (n // W) * W
    beta_f32 = beta_arr[0, 0]

    pieces = []
    if n_main > 0:
        out_main = _swish_beta_2d(
            x_flat[:n_main].reshape(-1, W), beta_arr,
            target_block_bytes=target_block_bytes,
            vmem_limit_bytes=vmem_limit_bytes)
        pieces.append(out_main.reshape(-1))
    if n_main < n:
        tail = x_flat[n_main:].astype(jnp.float32)
        pieces.append((tail * jax.nn.sigmoid(beta_f32 * tail)).astype(dtype))
    out_flat = pieces[0] if len(pieces) == 1 else jnp.concatenate(pieces)
    return out_flat.reshape(orig_shape)


if __name__ == "__main__":
    key = jax.random.PRNGKey(0)
    # NCHW conv-activation shape, matching how SwishBeta is used in the model.
    x = jax.random.normal(key, (2, 4, 16, 16), dtype=jnp.float32)
    beta = jnp.float32(1.0)  # nn.Parameter init in SwishBeta.__init__

    out = jax.block_until_ready(swish_beta(x, beta))

    # Reference check against plain JAX.
    ref = x * jax.nn.sigmoid(beta * x)
    assert out.shape == x.shape and out.dtype == x.dtype
    assert jnp.allclose(out, ref, atol=1e-5, rtol=1e-5), float(
        jnp.max(jnp.abs(out - ref)))
    print("KERNEL_OK")
</pallas_src>

<mosaic_0001>
module attributes {stable_mosaic.version = 11 : i64} {
  func.func @_swish_beta_kernel(%arg0: i32, %arg1: memref<1x1xf32, #tpu.memory_space<smem>>, %arg2: memref<2x1024xf32, #tpu.memory_space<vmem>>, %arg3: memref<2x1024xf32, #tpu.memory_space<vmem>>) attributes {dimension_semantics = [#tpu.dimension_semantics<parallel>], iteration_bounds = array<i64: 1>, scalar_prefetch = 0 : i64, scratch_operands = 0 : i64, tpu.core_type = #tpu.core_type<tc>, window_params = [{transform_indices = @transform_0, window_bounds = array<i64: 1, 1>}, {transform_indices = @transform_1, window_bounds = array<i64: 2, 1024>}, {transform_indices = @transform_2, window_bounds = array<i64: 2, 1024>}]} {
    %c0 = arith.constant 0 : index
    %c0_0 = arith.constant 0 : index
    %0 = memref.load %arg1[%c0, %c0_0] : memref<1x1xf32, #tpu.memory_space<smem>>
    %cst = arith.constant 5.000000e-01 : f32
    %1 = arith.mulf %cst, %0 : f32
    %c0_1 = arith.constant 0 : index
    %c0_2 = arith.constant 0 : index
    %2 = vector.load %arg2[%c0_1, %c0_2] : memref<2x1024xf32, #tpu.memory_space<vmem>>, vector<2x1024xf32>
    %cst_3 = arith.constant 5.000000e-01 : f32
    %3 = vector.broadcast %cst_3 : f32 to vector<2x1024xf32>
    %4 = arith.mulf %3, %2 : vector<2x1024xf32>
    %5 = vector.broadcast %1 : f32 to vector<2x1024xf32>
    %6 = arith.mulf %5, %2 : vector<2x1024xf32>
    %7 = math.tanh %6 : vector<2x1024xf32>
    %cst_4 = arith.constant 1.000000e+00 : f32
    %8 = vector.broadcast %cst_4 : f32 to vector<2x1024xf32>
    %9 = arith.addf %8, %7 : vector<2x1024xf32>
    %10 = arith.mulf %4, %9 : vector<2x1024xf32>
    %c0_5 = arith.constant 0 : index
    %c0_6 = arith.constant 0 : index
    %11 = vector.load %arg3[%c0_5, %c0_6] : memref<2x1024xf32, #tpu.memory_space<vmem>>, vector<2x1024xf32>
    tpu.vector_store %arg3[%c0_5, %c0_6], %10 {strides = array<i32>} : memref<2x1024xf32, #tpu.memory_space<vmem>>, vector<2x1024xf32>,
    return
  }
  func.func @transform_0(%arg0: i32) -> (i32, i32) {
    %c0_i32 = arith.constant 0 : i32
    %c0_i32_0 = arith.constant 0 : i32
    %c0_i32_1 = arith.constant 0 : i32
    return %c0_i32, %c0_i32_0 : i32, i32
  }
  func.func @transform_1(%arg0: i32) -> (i32, i32) {
    %c0_i32 = arith.constant 0 : i32
    %c0_i32_0 = arith.constant 0 : i32
    return %arg0, %c0_i32 : i32, i32
  }
  func.func @transform_2(%arg0: i32) -> (i32, i32) {
    %c0_i32 = arith.constant 0 : i32
    %c0_i32_0 = arith.constant 0 : i32
    return %arg0, %c0_i32 : i32, i32
  }
}

</mosaic_0001>

<bundles_post_ra>
// kernel: tpu_custom_call.1
= control target key start
LH: loop header
LB: loop body
LE: loop exit
PB: predicated region body
PF: predicated region fallthrough
CT: control target
= control target key end

     0   :  { %8 = vsyncpa [#allocation4], 0  ;;  %s145_s0 = inlined_call_operand.<no memory space> [shape: f32[1,1], index: 0, kind: input, shape index: {}]   ;;  %s146_s1 = inlined_call_operand.hbm [shape: f32[2,1024], index: 1, kind: input, shape index: {}]   ;;  %s147_s2 = inlined_call_operand.hbm [shape: f32[2,1024], index: 2, kind: output, shape index: {}]  }
   0x1   :  { %9 = vsyncpa [#allocation5], 0  ;;  %s17_s11 = sshll.u32 %s146_s1, 4  ;;  %s119_s12 = smov [#allocation3]   ;;  %s18_s11 = int_to_ptr.hbm [resolvable:$true] %s17_s11 }
   0x2   :  { %s19_s13 = sshll.u32 %s119_s12, 4  ;;  %s20_s13 = int_to_ptr.vmem [resolvable:$true] %s19_s13 }
   0x3   :  { %22 = dma.hbm_to_vmem [thread:$0]  %s18_s11, 256, %s20_s13, [#allocation4]  }
   0x4   :  { %115 = dma.done.wait [#allocation4], 256  }
   0x5   :  { %116 = vsyncadd [#allocation4], 4294967040  ;;  %s28_s16 = smul.f32 0.5, %s145_s0  ;;  %v29_v1 = vld [vmem:[#allocation3] sm:$0xff]  ;;  %v30_v2 = vld [vmem:[#allocation3 + $0x8] sm:$0xff]  ;;  %s120_s1 = smov [#allocation6]  }
   0x6   :  { %v31_v5 = vmul.f32 0.5, %v29_v1  ;;  %v32_v7 = vmul.f32 0.5, %v30_v2  ;;  %s49_s17 = sshll.u32 %s120_s1, 4  ;;  %s51_s20 = sshll.u32 %s147_s2, 4  ;;  %s50_s17 = int_to_ptr.vmem [resolvable:$true] %s49_s17  ;;  %s52_s20 = int_to_ptr.hbm [resolvable:$true] %s51_s20 }
   0x7   :  { %v33_v0 = vstv %s28_s16 }
   0x8   :  { %v34_v3 = vmul.f32 %v33_v0, %v29_v1  ;;  %v35_v4 = vmul.f32 %v33_v0, %v30_v2 }
   0xa   :  { %63 = vtanh.f32 %v34_v3 }
   0xb   :  { %65 = vtanh.f32 %v35_v4 }
  0x10   :  { %v64_v6 = vpop.eup %63 }
  0x11   :  { %v66_v8 = vpop.eup %65  ;;  %v38_v9 = vadd.f32 1.0, %v64_v6 }
  0x12   :  { %v39_v10 = vadd.f32 1.0, %v66_v8 }
  0x13   :  { %v40_v11 = vmul.f32 %v38_v9, %v31_v5 }
  0x14   :  { %v41_v12 = vmul.f32 %v39_v10, %v32_v7 }
  0x15   :  { %42 = vst [vmem:[#allocation6] sm:$0xff] %v40_v11 }
  0x16   :  { %43 = vst [vmem:[#allocation6 + $0x8] sm:$0xff] %v41_v12 }
  0x17   :  { %54 = dma.vmem_to_hbm [thread:$0]  %s50_s17, 256, %s52_s20, [#allocation5]  }
  0x18   :  { %117 = dma.done.wait [#allocation5], 256  }
  0x19   :  { %118 = vsyncadd [#allocation5], 4294967040 }
  0x1a   :  { %59 = vsyncpa [#allocation4], 1 }
  0x1b   :  { %60 = vsyncpa [#allocation5], 1 }

</bundles_post_ra>
